<compile_context>
chip_gen: v7x
topology: tpu7x:2x2x1
jax: 0.10.0
libtpu: 0.0.40
codegen_flags: <defaults>
</compile_context>

<pallas_src>
import jax
import jax.numpy as jnp
from jax import lax
from jax.experimental import pallas as pl
from jax.experimental.pallas import tpu as pltpu

_LANES = 128


def _mse_kernel(n_ref, x_ref, t_ref, o_ref, acc_ref):
    """Accumulate sum((x - t)^2) over row-tiles; finalize mean on last step.

    n_ref  : SMEM scalar-prefetch (1,) int32 -- true (unpadded) element count
    x_ref  : (tile_rows, 128) block of input  (native dtype)
    t_ref  : (tile_rows, 128) block of target (native dtype)
    o_ref  : (1, 1) f32 output (the scalar loss)
    acc_ref: (8, 128) f32 VMEM accumulator (vreg-shaped partial sums)
    """
    step = pl.program_id(0)

    @pl.when(step == 0)
    def _():
        acc_ref[...] = jnp.zeros_like(acc_ref)

    tile_rows, lanes = x_ref.shape
    d = x_ref[...].astype(jnp.float32) - t_ref[...].astype(jnp.float32)
    sq = d * d

    # Mask tail elements: lane padding of the last valid row and any
    # out-of-bounds rows of the final (partial) block. Garbage in the OOB
    # region (even NaN/Inf) is discarded by the select. A few VPU ops,
    # hidden under the input DMA.
    row_idx = lax.broadcasted_iota(jnp.int32, (tile_rows, lanes), 0)
    lane_idx = lax.broadcasted_iota(jnp.int32, (tile_rows, lanes), 1)
    elem_idx = row_idx * lanes + lane_idx
    # elements remaining starting at this tile (int32: assumes n < 2**31;
    # for larger tensors pass n as two int32s or a float64-split pair)
    rem = n_ref[0] - step * (tile_rows * lanes)
    sq = jnp.where(elem_idx < rem, sq, 0.0)

    # vreg-shaped accumulation: reduce only over the leading sublane-group
    # axis (pure VPU vreg adds; no per-step XLU scalar reduction).
    acc_ref[...] += jnp.sum(sq.reshape(-1, 8, lanes), axis=0)

    @pl.when(step == pl.num_programs(0) - 1)
    def _():
        total = jnp.sum(acc_ref[...], keepdims=True)  # (1, 1), single XLU pass
        o_ref[...] = total / n_ref[0].astype(jnp.float32)


def _sublane_multiple(dtype) -> int:
    """Second-to-last-dim tiling requirement: 8 (f32), 16 (bf16), 32 (int8)."""
    itemsize = jnp.dtype(dtype).itemsize
    return 8 * max(1, 4 // itemsize)


def _make_slab(a):
    """Flatten to 1D (native dtype), pad to a 128 multiple, view as (rows, 128)."""
    n = a.size
    rows = pl.cdiv(n, _LANES)
    flat = a.reshape(-1)
    pad = rows * _LANES - n
    if pad:
        flat = jnp.pad(flat, (0, pad))
    return flat.reshape(rows, _LANES)


def _mse_from_slabs(x2, t2, n_elems, *, tile_rows=1024):
    rows, lanes = x2.shape
    assert lanes == _LANES and t2.shape == x2.shape
    assert n_elems > 0

    sub = max(_sublane_multiple(x2.dtype), _sublane_multiple(t2.dtype))
    # requested tile -> multiple of the packing requirement, clamped to data
    tile_rows = max(sub, (int(tile_rows) // sub) * sub)
    tile_rows = min(tile_rows, pl.cdiv(rows, sub) * sub)

    grid = (pl.cdiv(rows, tile_rows),)
    n_arr = jnp.array([n_elems], dtype=jnp.int32)

    out = pl.pallas_call(
        _mse_kernel,
        out_shape=jax.ShapeDtypeStruct((1, 1), jnp.float32),
        grid_spec=pltpu.PrefetchScalarGridSpec(
            num_scalar_prefetch=1,
            grid=grid,
            in_specs=[
                pl.BlockSpec((tile_rows, _LANES), lambda i, n: (i, 0)),
                pl.BlockSpec((tile_rows, _LANES), lambda i, n: (i, 0)),
            ],
            out_specs=pl.BlockSpec((1, 1), lambda i, n: (0, 0)),
            scratch_shapes=[pltpu.VMEM((8, _LANES), jnp.float32)],
        ),
        compiler_params=pltpu.CompilerParams(
            dimension_semantics=("arbitrary",),  # sequential reduction axis
        ),
    )(n_arr, x2, t2)

    return out[0, 0]


def content_loss_mse(x, target, *, tile_rows=1024):
    """Pallas implementation of nn.MSELoss()(x, target) (mean reduction)."""
    assert x.shape == target.shape, "input / target shapes must match"
    return _mse_from_slabs(_make_slab(x), _make_slab(target), x.size,
                           tile_rows=tile_rows)


class ContentLossMSE:
    """JAX/Pallas analogue of the PyTorch ContentLossMSE module."""

    def __init__(self, target, *, tile_rows=1024):
        self._shape = target.shape
        self._n_elems = target.size
        self._tile_rows = tile_rows
        # precompute the target slab once (fixed buffer) -- no per-call
        # re-pad / re-copy of the target.
        self._target_slab = _make_slab(target)

    def __call__(self, x):
        assert x.shape == self._shape, "input / target shapes must match"
        return _mse_from_slabs(_make_slab(x), self._target_slab,
                               self._n_elems, tile_rows=self._tile_rows)


if __name__ == "__main__":
    key = jax.random.PRNGKey(0)
    kx, kt, kx2, kt2, kx3, kt3 = jax.random.split(key, 6)

    # 1) Small NCHW feature map (what a style-transfer content layer sees).
    shape = (2, 4, 16, 16)
    x = jax.random.normal(kx, shape, dtype=jnp.float32)
    target = jax.random.normal(kt, shape, dtype=jnp.float32)
    module = ContentLossMSE(target)
    loss = jax.block_until_ready(module(x))
    ref = jnp.mean((x - target) ** 2)
    assert jnp.allclose(loss, ref, rtol=1e-5, atol=1e-6), (loss, ref)

    # 2) Ragged size (not a multiple of 128) exercises pad + in-kernel mask.
    shape2 = (1, 3, 13, 17)
    x2 = jax.random.normal(kx2, shape2, dtype=jnp.float32)
    t2 = jax.random.normal(kt2, shape2, dtype=jnp.float32)
    loss2 = jax.block_until_ready(content_loss_mse(x2, t2))
    ref2 = jnp.mean((x2 - t2) ** 2)
    assert jnp.allclose(loss2, ref2, rtol=1e-5, atol=1e-6), (loss2, ref2)

    # 3) bf16 inputs: fed in native dtype (half the HBM bytes), upcast in-kernel.
    x3 = jax.random.normal(kx3, shape, dtype=jnp.float32).astype(jnp.bfloat16)
    t3 = jax.random.normal(kt3, shape, dtype=jnp.float32).astype(jnp.bfloat16)
    loss3 = jax.block_until_ready(content_loss_mse(x3, t3))
    ref3 = jnp.mean((x3.astype(jnp.float32) - t3.astype(jnp.float32)) ** 2)
    assert jnp.allclose(loss3, ref3, rtol=1e-4, atol=1e-5), (loss3, ref3)

    print("KERNEL_OK")
</pallas_src>

<mosaic_0001>
module attributes {stable_mosaic.version = 11 : i64} {
  func.func @_mse_kernel(%arg0: i32, %arg1: memref<1xi32, #tpu.memory_space<smem>>, %arg2: memref<16x128xf32, #tpu.memory_space<vmem>>, %arg3: memref<16x128xf32, #tpu.memory_space<vmem>>, %arg4: memref<1x1xf32, #tpu.memory_space<vmem>>, %arg5: memref<8x128xf32, #tpu.memory_space<vmem>>) attributes {dimension_semantics = [#tpu.dimension_semantics<arbitrary>], iteration_bounds = array<i64: 1>, scalar_prefetch = 1 : i64, scratch_operands = 1 : i64, tpu.core_type = #tpu.core_type<tc>, window_params = [{transform_indices = @transform_0, window_bounds = array<i64: 16, 128>}, {transform_indices = @transform_1, window_bounds = array<i64: 16, 128>}, {pipeline_mode = #tpu.pipeline_mode<synchronous>, transform_indices = @transform_2, window_bounds = array<i64: 1, 1>}]} {
    %c0_i32 = arith.constant 0 : i32
    %0 = arith.cmpi eq, %arg0, %c0_i32 : i32
    %1 = arith.extui %0 : i1 to i32
    %c0_i32_0 = arith.constant 0 : i32
    %2 = arith.cmpi ne, %1, %c0_i32_0 : i32
    scf.if %2 {
      %cst_12 = arith.constant 0.000000e+00 : f32
      %27 = vector.broadcast %cst_12 : f32 to vector<8x128xf32>
      %c0_13 = arith.constant 0 : index
      %c0_14 = arith.constant 0 : index
      %28 = vector.load %arg5[%c0_13, %c0_14] : memref<8x128xf32, #tpu.memory_space<vmem>>, vector<8x128xf32>
      tpu.vector_store %arg5[%c0_13, %c0_14], %27 {strides = array<i32>} : memref<8x128xf32, #tpu.memory_space<vmem>>, vector<8x128xf32>,
    } else {
    }
    %c0 = arith.constant 0 : index
    %c0_1 = arith.constant 0 : index
    %3 = vector.load %arg2[%c0, %c0_1] : memref<16x128xf32, #tpu.memory_space<vmem>>, vector<16x128xf32>
    %c0_2 = arith.constant 0 : index
    %c0_3 = arith.constant 0 : index
    %4 = vector.load %arg3[%c0_2, %c0_3] : memref<16x128xf32, #tpu.memory_space<vmem>>, vector<16x128xf32>
    %5 = arith.subf %3, %4 : vector<16x128xf32>
    %6 = arith.mulf %5, %5 : vector<16x128xf32>
    %7 = tpu.iota {dimensions = array<i32: 0>} : vector<16x128xi32>
    %8 = tpu.iota {dimensions = array<i32: 1>} : vector<16x128xi32>
    %c128_i32 = arith.constant 128 : i32
    %9 = vector.broadcast %c128_i32 : i32 to vector<16x128xi32>
    %10 = arith.muli %7, %9 : vector<16x128xi32>
    %11 = arith.addi %10, %8 : vector<16x128xi32>
    %c0_4 = arith.constant 0 : index
    %12 = memref.load %arg1[%c0_4] : memref<1xi32, #tpu.memory_space<smem>>
    %c2048_i32 = arith.constant 2048 : i32
    %13 = arith.muli %arg0, %c2048_i32 : i32
    %14 = arith.subi %12, %13 : i32
    %15 = vector.broadcast %14 : i32 to vector<16x128xi32>
    %16 = arith.cmpi slt, %11, %15 : vector<16x128xi32>
    %cst = arith.constant 0.000000e+00 : f32
    %17 = vector.broadcast %cst : f32 to vector<16x128xf32>
    %18 = arith.select %16, %6, %17 : vector<16x128xi1>, vector<16x128xf32>
    %c0_5 = arith.constant 0 : index
    %c0_6 = arith.constant 0 : index
    %19 = vector.load %arg5[%c0_5, %c0_6] : memref<8x128xf32, #tpu.memory_space<vmem>>, vector<8x128xf32>
    %20 = vector.shape_cast %18 : vector<16x128xf32> to vector<2x8x128xf32>
    %cst_7 = arith.constant dense<0.000000e+00> : vector<8x128xf32>
    %21 = vector.multi_reduction <add>, %20, %cst_7 [0] : vector<2x8x128xf32> to vector<8x128xf32>
    %22 = arith.addf %19, %21 : vector<8x128xf32>
    %c0_8 = arith.constant 0 : index
    %c0_9 = arith.constant 0 : index
    %23 = vector.load %arg5[%c0_8, %c0_9] : memref<8x128xf32, #tpu.memory_space<vmem>>, vector<8x128xf32>
    tpu.vector_store %arg5[%c0_8, %c0_9], %22 {strides = array<i32>} : memref<8x128xf32, #tpu.memory_space<vmem>>, vector<8x128xf32>,
    %c0_i32_10 = arith.constant 0 : i32
    %24 = arith.cmpi eq, %arg0, %c0_i32_10 : i32
    %25 = arith.extui %24 : i1 to i32
    %c0_i32_11 = arith.constant 0 : i32
    %26 = arith.cmpi ne, %25, %c0_i32_11 : i32
    scf.if %26 {
      %c0_12 = arith.constant 0 : index
      %c0_13 = arith.constant 0 : index
      %27 = vector.load %arg5[%c0_12, %c0_13] : memref<8x128xf32, #tpu.memory_space<vmem>>, vector<8x128xf32>
      %28 = vector.shape_cast %27 : vector<8x128xf32> to vector<1x8x128xf32>
      %cst_14 = arith.constant dense<0.000000e+00> : vector<1xf32>
      %29 = vector.multi_reduction <add>, %28, %cst_14 [1, 2] : vector<1x8x128xf32> to vector<1xf32>
      %30 = vector.shape_cast %29 : vector<1xf32> to vector<1x1x1xf32>
      %31 = vector.extract %30[0, 0, 0] : f32 from vector<1x1x1xf32>
      %32 = vector.broadcast %31 : f32 to vector<1x1xf32>
      %c0_15 = arith.constant 0 : index
      %33 = memref.load %arg1[%c0_15] : memref<1xi32, #tpu.memory_space<smem>>
      %34 = arith.sitofp %33 : i32 to f32
      %35 = vector.broadcast %34 : f32 to vector<1x1xf32>
      %36 = arith.divf %32, %35 : vector<1x1xf32>
      %c0_16 = arith.constant 0 : index
      %c0_17 = arith.constant 0 : index
      %37 = vector.load %arg4[%c0_16, %c0_17] : memref<1x1xf32, #tpu.memory_space<vmem>>, vector<1x1xf32>
      tpu.vector_store %arg4[%c0_16, %c0_17], %36 {strides = array<i32>} : memref<1x1xf32, #tpu.memory_space<vmem>>, vector<1x1xf32>,
    } else {
    }
    return
  }
  func.func @transform_0(%arg0: i32, %arg1: memref<1xi32, #tpu.memory_space<smem>>) -> (i32, i32) {
    %c0_i32 = arith.constant 0 : i32
    %c0_i32_0 = arith.constant 0 : i32
    return %arg0, %c0_i32 : i32, i32
  }
  func.func @transform_1(%arg0: i32, %arg1: memref<1xi32, #tpu.memory_space<smem>>) -> (i32, i32) {
    %c0_i32 = arith.constant 0 : i32
    %c0_i32_0 = arith.constant 0 : i32
    return %arg0, %c0_i32 : i32, i32
  }
  func.func @transform_2(%arg0: i32, %arg1: memref<1xi32, #tpu.memory_space<smem>>) -> (i32, i32) {
    %c0_i32 = arith.constant 0 : i32
    %c0_i32_0 = arith.constant 0 : i32
    %c0_i32_1 = arith.constant 0 : i32
    return %c0_i32, %c0_i32_0 : i32, i32
  }
}

</mosaic_0001>

<bundles_post_ra>
// kernel: tpu_custom_call.1
= control target key start
LH: loop header
LB: loop body
LE: loop exit
PB: predicated region body
PF: predicated region fallthrough
CT: control target
= control target key end

     0   :  { %9 = vsyncpa [#allocation6], 0  ;;  %s261_s0 = inlined_call_operand.<no memory space> [shape: s32[1], index: 0, kind: input, shape index: {}]   ;;  %s262_s1 = inlined_call_operand.hbm [shape: f32[16,128], index: 1, kind: input, shape index: {}]   ;;  %s263_s2 = inlined_call_operand.hbm [shape: f32[16,128], index: 2, kind: input, shape index: {}]   ;;  %s264_s3 = inlined_call_operand.hbm [shape: f32[1,1], index: 3, kind: output, shape index: {}]  }
   0x1   :  { %10 = vsyncpa [#allocation9], 0 }
   0x2   :  { %11 = vsyncpa [#allocation7], 0  ;;  %s194_s12 = smov [#allocation5]   ;;  %s122_s16 = scalar_lea.hbm %s262_s1, 256 }
   0x3   :  { %s17_s13 = sshll.u32 %s194_s12, 4  ;;  %p123_p0 = scmp.ne.s32.totalorder %s262_s1, %s122_s16  ;;  %s18_s13 = int_to_ptr.vmem [resolvable:$true] %s17_s13 }
   0x4   :  { %p126_p1 = scmp.lt.u32.totalorder %s122_s16, %s262_s1 }
   0x6   :  { %p128_p2 = pnand %p126_p1, %p123_p0 }
   0x8   :  { %131 = shalt.err (!%p128_p2)
}
   0x9   :  { %s132_s21 = scalar_lea.vmem %s18_s13, 256  ;;  %p137_p4 = scmp.lt.s32.totalorder %s18_s13, %s18_s13 }
   0xa   :  { %p133_p3 = scmp.ne.s32.totalorder %s18_s13, %s132_s21  ;;  %p138_p5 = scmp.lt.s32.totalorder %s132_s21, %s132_s21 }
   0xc   :  { %p139_p6 = por %p138_p5, %p137_p4 }
   0xe   :  { %p140_p7 = pnand %p139_p6, %p133_p3 }
  0x10   :  { %143 = shalt.err (!%p140_p7)
}
  0x11   :  { %s195_s22 = smov 128   ;;  %s196_s23 = smov 8  }
  0x12   :  { %23 = dma.hbm_to_vmem [thread:$0]  %s262_s1, 256, %s18_s13, [#allocation6], %s195_s22, %s195_s22, %s196_s23  }
  0x13   :  { %s197_s26 = smov [#allocation8]   ;;  %s144_s30 = scalar_lea.hbm %s263_s2, 256 }
  0x14   :  { %s29_s27 = sshll.u32 %s197_s26, 4  ;;  %p145_p8 = scmp.ne.s32.totalorder %s263_s2, %s144_s30  ;;  %s30_s27 = int_to_ptr.vmem [resolvable:$true] %s29_s27 }
  0x15   :  { %p148_p9 = scmp.lt.u32.totalorder %s144_s30, %s263_s2 }
  0x17   :  { %p150_p10 = pnand %p148_p9, %p145_p8 }
  0x19   :  { %153 = shalt.err (!%p150_p10)
}
  0x1a   :  { %s154_s8 = scalar_lea.vmem %s30_s27, 256  ;;  %p159_p12 = scmp.lt.s32.totalorder %s30_s27, %s30_s27 }
  0x1b   :  { %p155_p11 = scmp.ne.s32.totalorder %s30_s27, %s154_s8  ;;  %p160_p13 = scmp.lt.s32.totalorder %s154_s8, %s154_s8 }
  0x1d   :  { %p161_p0 = por %p160_p13, %p159_p12 }
  0x1f   :  { %p162_p1 = pnand %p161_p0, %p155_p11 }
  0x21   :  { %165 = shalt.err (!%p162_p1)
}
  0x22   :  { %35 = dma.hbm_to_vmem [thread:$0]  %s263_s2, 256, %s30_s27, [#allocation9], %s195_s22, %s195_s22, %s196_s23  }
  0x23   :  { %188 = dma.done.wait [#allocation6], 256  }
  0x24   :  { %189 = vsyncadd [#allocation6], 4294967040 }
  0x25   :  { %190 = dma.done.wait [#allocation9], 256  }
  0x26   :  { %191 = vsyncadd [#allocation9], 4294967040  ;;  %v55_v0 = vlaneseq  ;;  %v67_v7 = vstv %s261_s0  ;;  %v47_v8 = vld [vmem:[#allocation5] sm:$0xff]  ;;  %v48_v9 = vld [vmem:[#allocation5 + $0x8] sm:$0xff]  ;;  %s91_s13 = scvt.s32.f32 %s261_s0  ;;  %s198_s14 = smov [#allocation10]   ;;  %vm95_vm2 = vcmask 0  }
  0x27   :  { %v49_v10 = vld [vmem:[#allocation8] sm:$0xff]  ;;  %v50_v11 = vld [vmem:[#allocation8 + $0x8] sm:$0xff]  ;;  %s103_s15 = sshll.u32 %s198_s14, 4  ;;  %s104_s15 = int_to_ptr.vmem [resolvable:$true] %s103_s15 }
  0x28   :  { %v56_v1 = vshrl.u32 %v55_v0, 7  ;;  %v59_v2 = vand.u32 127, %v55_v0  ;;  %v51_v12 = vsub.f32 %v47_v8, %v49_v10  ;;  %v52_v14 = vsub.f32 %v48_v9, %v50_v11  ;;  %s166_s17 = scalar_lea.vmem %s104_s15, 16  ;;  %s170_s18 = scalar_lea.vmem %s104_s15, 32 }
  0x29   :  { %v92_v27 = vstv %s91_s13  ;;  %p167_p2 = scmp.ne.s32.totalorder %s104_s15, %s166_s17  ;;  %p171_p3 = scmp.lt.s32.totalorder %s104_s15, %s104_s15 }
  0x2a   :  { %v57_v3 = vadd.s32 8, %v56_v1  ;;  %v60_v4 = vmul.u32 128, %v56_v1  ;;  %v53_v15 = vmul.f32 %v51_v12, %v51_v12  ;;  %v54_v16 = vmul.f32 %v52_v14, %v52_v14  ;;  %p172_p4 = scmp.lt.s32.totalorder %s170_s18, %s166_s17 }
  0x2b   :  { %120 = vrcp.f32 %v92_v27 }
  0x2c   :  { %v61_v5 = vmul.u32 128, %v57_v3  ;;  %v62_v6 = vadd.s32 %v60_v4, %v59_v2  ;;  %p173_p5 = por %p172_p4, %p171_p3 }
  0x2e   :  { %v63_v13 = vadd.s32 %v61_v5, %v59_v2  ;;  %vm68_vm0 = vcmp.lt.s32.totalorder %v62_v6, %v67_v7  ;;  %p174_p6 = pnand %p173_p5, %p167_p2 }
  0x2f   :  { %v70_v17 = vsel %vm68_vm0, %v53_v15, 0.0 }
  0x30   :  { %vm69_vm1 = vcmp.lt.s32.totalorder %v63_v13, %v67_v7 }
  0x31   :  { %v71_v18 = vsel %vm69_vm1, %v54_v16, 0.0 }
  0x32   :  { %v73_v19 = vadd.f32 %v71_v18, %v70_v17 }
  0x34   :  { %80 = vadd.xlane.f32.xlu0 %v73_v19 }
  0x35   :  { %v121_v28 = vpop.eup %120 }
  0xc1   :  { %v81_v20 = vpop.xlane.xlu0 %80 }
  0xc2   :  { %v82_v21 = vrot.slane %v81_v20, 4 }
  0xc4   :  { %v83_v22 = vadd.f32 %v82_v21, %v81_v20 }
  0xc6   :  { %v84_v23 = vrot.slane %v83_v22, 2 }
  0xc8   :  { %v85_v24 = vadd.f32 %v84_v23, %v83_v22 }
  0xca   :  { %v86_v25 = vrot.slane %v85_v24, 1 }
  0xcc   :  { %v87_v26 = vadd.f32 %v86_v25, %v85_v24 }
  0xce   :  { %113 = vpush %v87_v26 }
  0xff   :  { %s114_s16 = spop %113 }
 0x100   :  { %v89_v29 = vstv %s114_s16 }
 0x101   :  { %v94_v30 = vmul.f32 %v121_v28, %v89_v29 }
 0x103   :  { %96 = vst.msk [vmem:[#allocation10] sm:$0x1] %vm95_vm2, %v94_v30 }
 0x104   :  { %177 = shalt.err (!%p174_p6)
}
 0x105   :  { %s178_s20 = scalar_lea.hbm %s264_s3, 16 }
 0x106   :  { %p179_p7 = scmp.ne.s32.totalorder %s264_s3, %s178_s20  ;;  %p182_p8 = scmp.lt.u32.totalorder %s178_s20, %s264_s3 }
 0x108   :  { %p184_p9 = pnand %p182_p8, %p179_p7 }
 0x10a   :  { %187 = shalt.err (!%p184_p9)
}
 0x10b   :  { %106 = dma.vmem_to_hbm [thread:$0]  %s104_s15, 16, %s264_s3, [#allocation7]  }
 0x10c   :  { %192 = dma.done.wait [#allocation7], 16  }
 0x10d   :  { %193 = vsyncadd [#allocation7], 4294967280 }
 0x10e   :  { %110 = vsyncpa [#allocation6], 1 }
 0x10f   :  { %111 = vsyncpa [#allocation9], 1 }
 0x110   :  { %112 = vsyncpa [#allocation7], 1 }

</bundles_post_ra>
